<compile_context>
chip_gen: v7x
topology: tpu7x:2x2x1
jax: 0.10.0
libtpu: 0.0.40
codegen_flags: <defaults>
</compile_context>

<pallas_src>
import jax
import jax.numpy as jnp
from jax import lax
from jax.experimental import pallas as pl
from jax.experimental.pallas import tpu as pltpu


def _round_up(x, m):
    return ((x + m - 1) // m) * m


def _hw_config():
    """Per-generation tile / VMEM configuration."""
    try:
        kind = jax.devices()[0].device_kind.lower()
    except Exception:
        kind = ""
    try:
        vmem_cap = int(pltpu.get_tpu_info().vmem_capacity_bytes)
    except Exception:
        vmem_cap = 64 << 20  # conservative (v7x-sized) fallback
    # leave headroom for Pallas-internal scratch / double-buffer bookkeeping
    vmem_limit = min(max(vmem_cap - (16 << 20), 32 << 20), 100 << 20)
    small_mxu = any(t in kind for t in ("v2", "v3", "v4", "v5"))  # 128-wide MXU
    tm = 128 if small_mxu else 256  # 256 on the 2x256^2 MXU generations (v6e/v7x)
    tk_cap = 4096 if vmem_limit >= (64 << 20) else 2048
    return tm, tk_cap, vmem_limit


# ----------------------------- kernels ---------------------------------------


def _feature_transform_kernel(x_ref, w_ref, out_ref):
    # out_tile = x_tile @ W   (bf16 MXU operands, f32 accumulation)
    out_ref[...] = jnp.dot(
        x_ref[...], w_ref[...], preferred_element_type=jnp.float32
    ).astype(out_ref.dtype)


def _prop_relu_kernel(a_ref, xw_ref, b_ref, out_ref, acc_ref):
    # acc += A_tile @ XW_tile ; epilogue: relu(acc + b1)
    k = pl.program_id(1)

    @pl.when(k == 0)
    def _():
        acc_ref[...] = jnp.zeros_like(acc_ref)

    acc_ref[...] += jnp.dot(a_ref[...], xw_ref[...], preferred_element_type=jnp.float32)

    @pl.when(k == pl.num_programs(1) - 1)
    def _():
        z = acc_ref[...] + b_ref[...]
        out_ref[...] = jnp.maximum(z, 0.0).astype(out_ref.dtype)


def _prop_w2_logsoftmax_kernel(a_ref, h_ref, w2_ref, b2_ref, out_ref, acc_ref):
    # acc += A_tile @ H_tile ; epilogue: log_softmax(acc @ W2 + b2).
    # Padded class columns carry b2 = -1e30 (W2's padded columns are zero), so they
    # drop out of max / exp / sum without any per-tile mask.
    k = pl.program_id(1)

    @pl.when(k == 0)
    def _():
        acc_ref[...] = jnp.zeros_like(acc_ref)

    acc_ref[...] += jnp.dot(a_ref[...], h_ref[...], preferred_element_type=jnp.float32)

    @pl.when(k == pl.num_programs(1) - 1)
    def _():
        z = jnp.dot(acc_ref[...], w2_ref[...], preferred_element_type=jnp.float32)
        z = z + b2_ref[...]
        m = jnp.max(z, axis=-1, keepdims=True)
        e = jnp.exp(z - m)
        lse = jnp.log(jnp.sum(e, axis=-1, keepdims=True)) + m
        out_ref[...] = (z - lse).astype(out_ref.dtype)


# --------------------------- pallas_call wrappers -----------------------------


def _feature_transform(x, w, *, tm, vmem_limit):
    """Row-tiled dense X @ W -> bf16 (feeds the propagation matmul)."""
    n, f = x.shape
    h = w.shape[1]
    flops = 2 * n * f * h
    bytes_accessed = int(
        x.size * x.dtype.itemsize + w.size * w.dtype.itemsize + n * h * 2
    )
    return pl.pallas_call(
        _feature_transform_kernel,
        out_shape=jax.ShapeDtypeStruct((n, h), jnp.bfloat16),
        grid=(n // tm,),
        in_specs=[
            pl.BlockSpec((tm, f), lambda i: (i, 0)),  # streamed row tiles of X
            pl.BlockSpec((f, h), lambda i: (0, 0)),   # resident weight
        ],
        out_specs=pl.BlockSpec((tm, h), lambda i: (i, 0)),
        compiler_params=pltpu.CompilerParams(
            dimension_semantics=("parallel",),
            vmem_limit_bytes=vmem_limit,
        ),
        cost_estimate=pl.CostEstimate(
            flops=flops, transcendentals=0, bytes_accessed=bytes_accessed
        ),
    )(x, w)


def _propagate_relu(a_hat, xw, b1, *, tm, tk, vmem_limit):
    """Layer-1 aggregation: relu(A_hat @ XW + b1), K-tiled with f32 accumulator."""
    n_pad = a_hat.shape[0]
    h = xw.shape[1]
    flops = 2 * n_pad * n_pad * h
    bytes_accessed = int(
        a_hat.size * 2 + xw.size * 2 * (n_pad // tm) + b1.size * 4 + n_pad * h * 2
    )
    return pl.pallas_call(
        _prop_relu_kernel,
        out_shape=jax.ShapeDtypeStruct((n_pad, h), jnp.bfloat16),
        grid=(n_pad // tm, n_pad // tk),
        in_specs=[
            pl.BlockSpec((tm, tk), lambda i, k: (i, k)),  # streamed A_hat tiles
            pl.BlockSpec((tk, h), lambda i, k: (k, 0)),   # streamed XW K-tiles
            pl.BlockSpec((1, h), lambda i, k: (0, 0)),    # bias row
        ],
        out_specs=pl.BlockSpec((tm, h), lambda i, k: (i, 0)),
        scratch_shapes=[pltpu.VMEM((tm, h), jnp.float32)],
        compiler_params=pltpu.CompilerParams(
            dimension_semantics=("parallel", "arbitrary"),
            vmem_limit_bytes=vmem_limit,
        ),
        cost_estimate=pl.CostEstimate(
            flops=flops, transcendentals=0, bytes_accessed=bytes_accessed
        ),
    )(a_hat, xw, b1)


def _propagate_w2_logsoftmax(a_hat, h, w2, b2, *, tm, tk, vmem_limit):
    """Layer-2: log_softmax(A_hat @ H @ W2 + b2), with H@W2 fused into the epilogue."""
    n_pad = a_hat.shape[0]
    h_dim = h.shape[1]
    c = w2.shape[1]
    flops = 2 * n_pad * n_pad * h_dim + 2 * n_pad * h_dim * c
    bytes_accessed = int(
        a_hat.size * 2 + h.size * 2 * (n_pad // tm) + w2.size * 4 + b2.size * 4
        + n_pad * c * 4
    )
    return pl.pallas_call(
        _prop_w2_logsoftmax_kernel,
        out_shape=jax.ShapeDtypeStruct((n_pad, c), jnp.float32),
        grid=(n_pad // tm, n_pad // tk),
        in_specs=[
            pl.BlockSpec((tm, tk), lambda i, k: (i, k)),    # streamed A_hat tiles
            pl.BlockSpec((tk, h_dim), lambda i, k: (k, 0)),  # streamed H K-tiles
            pl.BlockSpec((h_dim, c), lambda i, k: (0, 0)),   # resident W2
            pl.BlockSpec((1, c), lambda i, k: (0, 0)),       # bias row (pad = -1e30)
        ],
        out_specs=pl.BlockSpec((tm, c), lambda i, k: (i, 0)),
        scratch_shapes=[pltpu.VMEM((tm, h_dim), jnp.float32)],
        compiler_params=pltpu.CompilerParams(
            dimension_semantics=("parallel", "arbitrary"),
            vmem_limit_bytes=vmem_limit,
        ),
        cost_estimate=pl.CostEstimate(
            flops=flops, transcendentals=n_pad * c, bytes_accessed=bytes_accessed
        ),
    )(a_hat, h, w2, b2)


# ------------------------------ forward pass ----------------------------------


def build_normalized_adjacency_padded(edge_index, edge_weight, num_nodes, n_pad):
    """Dense symmetric-normalized adjacency (no self loops), built directly padded
    and cast once to bf16.  Matches PyG gcn_norm with add_self_loops=False."""
    src = edge_index[0]
    tgt = edge_index[1]
    deg = jnp.zeros((num_nodes,), jnp.float32).at[tgt].add(edge_weight)
    deg_inv_sqrt = jnp.where(deg > 0, lax.rsqrt(deg), 0.0)
    norm = deg_inv_sqrt[src] * edge_weight * deg_inv_sqrt[tgt]
    a = jnp.zeros((n_pad, n_pad), jnp.float32).at[tgt, src].add(norm)
    return a.astype(jnp.bfloat16)


def gcn_net_forward(x, edge_index, edge_weight, w1, b1, w2, b2):
    """Full GCNNet forward (eval mode) built from K-tiled Pallas kernels."""
    n, f = x.shape
    hidden = w1.shape[1]
    num_classes = w2.shape[1]

    h_pad = _round_up(hidden, 128)       # lane-dense hidden width
    c_pad = _round_up(num_classes, 128)  # lane-dense class width

    tm, tk_cap, vmem_limit = _hw_config()
    n_pad_min = _round_up(n, tm)
    tk = tm
    while tk * 2 <= min(n_pad_min, tk_cap):
        tk *= 2
    n_pad = _round_up(n, tk)  # tk is a multiple of tm, so n_pad is too

    # Padded operands (bf16 MXU streams; biases stay f32 for the epilogues).
    a_p = build_normalized_adjacency_padded(edge_index, edge_weight, n, n_pad)
    x_p = jnp.pad(x.astype(jnp.bfloat16), ((0, n_pad - n), (0, 0)))
    w1_p = jnp.pad(w1.astype(jnp.bfloat16), ((0, 0), (0, h_pad - hidden)))
    b1_p = jnp.pad(b1.astype(jnp.float32), (0, h_pad - hidden)).reshape(1, h_pad)
    w2_p = jnp.pad(
        w2.astype(jnp.float32), ((0, h_pad - hidden), (0, c_pad - num_classes))
    )
    # padded class columns get -1e30 so the f32 epilogue log_softmax ignores them
    b2_p = (
        jnp.full((c_pad,), -1e30, jnp.float32)
        .at[:num_classes]
        .set(b2.astype(jnp.float32))
        .reshape(1, c_pad)
    )

    # layer 1: H = relu(A_hat @ (X @ W1) + b1)
    xw1 = _feature_transform(x_p, w1_p, tm=tm, vmem_limit=vmem_limit)
    h = _propagate_relu(a_p, xw1, b1_p, tm=tm, tk=tk, vmem_limit=vmem_limit)

    # TODO(synk): F.dropout is identity in eval mode (self.training=False);
    # training-mode dropout (pltpu.prng_random_bits mask on h) is not emitted here.

    # layer 2: out = log_softmax(A_hat @ H @ W2 + b2)  (H@W2 fused into the epilogue)
    out_p = _propagate_w2_logsoftmax(
        a_p, h, w2_p, b2_p, tm=tm, tk=tk, vmem_limit=vmem_limit
    )

    return out_p[:n, :num_classes]


if __name__ == "__main__":
    key = jax.random.PRNGKey(0)

    # small synthetic graph, consistent with GCNNet(num_feats, num_classes)
    num_nodes = 256
    num_feats = 16
    hidden = 32
    num_classes = 8
    num_edges = 1024

    k_x, k_src, k_tgt, k_w, k_w1, k_w2 = jax.random.split(key, 6)

    x = jax.random.normal(k_x, (num_nodes, num_feats), dtype=jnp.float32)
    src = jax.random.randint(k_src, (num_edges,), 0, num_nodes)
    tgt = jax.random.randint(k_tgt, (num_edges,), 0, num_nodes)
    edge_index = jnp.stack([src, tgt], axis=0)
    edge_weight = jax.random.uniform(k_w, (num_edges,), dtype=jnp.float32) + 0.1

    # deterministic parameter init (glorot-style weights, zero biases, matching
    # GCNConv's Linear(in, out, bias=False) weight + conv bias shapes)
    lim1 = (6.0 / (num_feats + hidden)) ** 0.5
    w1 = jax.random.uniform(k_w1, (num_feats, hidden), jnp.float32, -lim1, lim1)
    b1 = jnp.zeros((hidden,), jnp.float32)
    lim2 = (6.0 / (hidden + num_classes)) ** 0.5
    w2 = jax.random.uniform(k_w2, (hidden, num_classes), jnp.float32, -lim2, lim2)
    b2 = jnp.zeros((num_classes,), jnp.float32)

    out = gcn_net_forward(x, edge_index, edge_weight, w1, b1, w2, b2)
    out = jax.block_until_ready(out)

    # pure-JAX f32 reference of the same forward pass
    deg = jnp.zeros((num_nodes,), jnp.float32).at[tgt].add(edge_weight)
    deg_inv_sqrt = jnp.where(deg > 0, lax.rsqrt(deg), 0.0)
    norm = deg_inv_sqrt[src] * edge_weight * deg_inv_sqrt[tgt]
    a_ref = jnp.zeros((num_nodes, num_nodes), jnp.float32).at[tgt, src].add(norm)
    h_ref = jnp.maximum(a_ref @ (x @ w1) + b1, 0.0)
    ref = jax.nn.log_softmax(a_ref @ (h_ref @ w2) + b2, axis=-1)

    probs_sum = jnp.sum(jnp.exp(out), axis=-1)
    assert out.shape == (num_nodes, num_classes)
    assert bool(jnp.all(jnp.abs(probs_sum - 1.0) < 1e-4))
    assert bool(jnp.max(jnp.abs(out - ref)) < 0.15), float(jnp.max(jnp.abs(out - ref)))

    print("KERNEL_OK")
</pallas_src>

<mosaic_0001>
module attributes {stable_mosaic.version = 11 : i64} {
  func.func @_feature_transform_kernel(%arg0: i32, %arg1: memref<256x16xbf16, #tpu.memory_space<vmem>>, %arg2: memref<16x128xbf16, #tpu.memory_space<vmem>>, %arg3: memref<256x128xbf16, #tpu.memory_space<vmem>>) attributes {dimension_semantics = [#tpu.dimension_semantics<parallel>], iteration_bounds = array<i64: 1>, scalar_prefetch = 0 : i64, scratch_operands = 0 : i64, tpu.core_type = #tpu.core_type<tc>, window_params = [{transform_indices = @transform_0, window_bounds = array<i64: 256, 16>}, {pipeline_mode = #tpu.pipeline_mode<synchronous>, transform_indices = @transform_1, window_bounds = array<i64: 16, 128>}, {transform_indices = @transform_2, window_bounds = array<i64: 256, 128>}]} {
    %c0 = arith.constant 0 : index
    %c0_0 = arith.constant 0 : index
    %0 = vector.load %arg1[%c0, %c0_0] : memref<256x16xbf16, #tpu.memory_space<vmem>>, vector<256x16xbf16>
    %c0_1 = arith.constant 0 : index
    %c0_2 = arith.constant 0 : index
    %1 = vector.load %arg2[%c0_1, %c0_2] : memref<16x128xbf16, #tpu.memory_space<vmem>>, vector<16x128xbf16>
    %cst = arith.constant dense<0.000000e+00> : vector<256x128xf32>
    %2 = tpu.matmul %0, %1, %cst {dimension_numbers = #tpu.dot_dimension_numbers<[1], [0], [0], [1], [0, 0, 1, 1], [], []>} : vector<256x16xbf16>, vector<16x128xbf16>, vector<256x128xf32> -> vector<256x128xf32>
    %3 = arith.truncf %2 : vector<256x128xf32> to vector<256x128xbf16>
    %c0_3 = arith.constant 0 : index
    %c0_4 = arith.constant 0 : index
    %4 = vector.load %arg3[%c0_3, %c0_4] : memref<256x128xbf16, #tpu.memory_space<vmem>>, vector<256x128xbf16>
    tpu.vector_store %arg3[%c0_3, %c0_4], %3 {strides = array<i32>} : memref<256x128xbf16, #tpu.memory_space<vmem>>, vector<256x128xbf16>,
    return
  }
  func.func @transform_0(%arg0: i32) -> (i32, i32) {
    %c0_i32 = arith.constant 0 : i32
    %c0_i32_0 = arith.constant 0 : i32
    return %arg0, %c0_i32 : i32, i32
  }
  func.func @transform_1(%arg0: i32) -> (i32, i32) {
    %c0_i32 = arith.constant 0 : i32
    %c0_i32_0 = arith.constant 0 : i32
    %c0_i32_1 = arith.constant 0 : i32
    return %c0_i32, %c0_i32_0 : i32, i32
  }
  func.func @transform_2(%arg0: i32) -> (i32, i32) {
    %c0_i32 = arith.constant 0 : i32
    %c0_i32_0 = arith.constant 0 : i32
    return %arg0, %c0_i32 : i32, i32
  }
}

</mosaic_0001>

<bundles_post_ra>
// kernel: tpu_custom_call.1
= control target key start
LH: loop header
LB: loop body
LE: loop exit
PB: predicated region body
PF: predicated region fallthrough
CT: control target
= control target key end

     0   :  { %vm133_vm0 = vcmask 130048   ;;  %s905_s0 = inlined_call_operand.vmem [shape: bf16[256,16], index: 0, kind: input, shape index: {}]   ;;  %s906_s1 = inlined_call_operand.vmem [shape: bf16[16,128], index: 1, kind: input, shape index: {}]   ;;  %s907_s2 = inlined_call_operand.hbm [shape: bf16[256,128], index: 2, kind: output, shape index: {}]  }
   0x1   :  { %v767_v0 = vld [vmem:[%s906_s1] sm:$0xff]   ;;  %v770_v3 = vld [vmem:[%s905_s0 + $0x8] sm:$0xff]   ;;  %v772_v5 = vld [vmem:[%s905_s0 + $0x10] sm:$0xff]  }
   0x2   :  { %v768_v1 = vld [vmem:[%s905_s0] sm:$0xff]   ;;  %728 = vmatprep.subr.bf16.mxu0 %v767_v0  ;;  %762 = vmatprep.subr.bf16.mxu1 %v767_v0  ;;  %v771_v4 = vld [vmem:[%s905_s0 + $0x48] sm:$0xff]   ;;  %v773_v6 = vld [vmem:[%s905_s0 + $0x50] sm:$0xff]  }
   0x3   :  { %v769_v2 = vld [vmem:[%s905_s0 + $0x40] sm:$0xff]   ;;  %729 = vmatpush3.bf16.msra.mxu0 %v767_v0  ;;  %763 = vmatpush3.bf16.msra.mxu1 %v767_v0  ;;  %v774_v7 = vld [vmem:[%s905_s0 + $0x18] sm:$0xff]  }
   0x4   :  { %730 = vmatprep.mubr.msk.bf16.mxu0 %vm133_vm0, %v768_v1  ;;  %746 = vmatprep.mubr.msk.bf16.mxu1 %vm133_vm0, %v769_v2  ;;  %v775_v8 = vld [vmem:[%s905_s0 + $0x58] sm:$0xff]   ;;  %v776_v9 = vld [vmem:[%s905_s0 + $0x20] sm:$0xff]  }
   0x5   :  { %v777_v10 = vld [vmem:[%s905_s0 + $0x60] sm:$0xff]  }
   0x6   :  { %731 = vmatmul.mubr.msk.bf16.vlgmr.msra.gmra.mrb[0].mxu0 %vm133_vm0, %v770_v3  ;;  %747 = vmatmul.mubr.msk.bf16.vlgmr.msra.gmra.mrb[0].mxu1 %vm133_vm0, %v771_v4 }
   0x7   :  { %734 = vmatprep.mubr.msk.bf16.mxu0 %vm133_vm0, %v772_v5  ;;  %750 = vmatprep.mubr.msk.bf16.mxu1 %vm133_vm0, %v773_v6 }
   0xe   :  { %735 = vmatmul.mubr.msk.bf16.gmra.mrb[4].mxu0 %vm133_vm0, %v774_v7  ;;  %751 = vmatmul.mubr.msk.bf16.gmra.mrb[4].mxu1 %vm133_vm0, %v775_v8 }
   0xf   :  { %738 = vmatprep.mubr.msk.bf16.mxu0 %vm133_vm0, %v776_v9  ;;  %754 = vmatprep.mubr.msk.bf16.mxu1 %vm133_vm0, %v777_v10 }
  0x10   :  { %7 = vsyncpa [#allocation3], 0  ;;  %v778_v11 = vld [vmem:[%s905_s0 + $0x28] sm:$0xff]   ;;  %v780_v13 = vld [vmem:[%s905_s0 + $0x30] sm:$0xff]  }
  0x11   :  { %v779_v12 = vld [vmem:[%s905_s0 + $0x68] sm:$0xff]   ;;  %v781_v14 = vld [vmem:[%s905_s0 + $0x70] sm:$0xff]   ;;  %v782_v15 = vld [vmem:[%s905_s0 + $0x38] sm:$0xff]  }
  0x12   :  { %v783_v16 = vld [vmem:[%s905_s0 + $0x78] sm:$0xff]   ;;  %s808_s0 = smov [#allocation2]  }
  0x13   :  { %s508_s14 = sshll.u32 %s808_s0, 4  ;;  %s509_s14 = int_to_ptr.vmem [resolvable:$true] %s508_s14 }
  0x14   :  { %s784_s15 = scalar_lea.vmem %s509_s14, 2048  ;;  %p789_p1 = scmp.lt.s32.totalorder %s509_s14, %s509_s14 }
  0x15   :  { %p785_p0 = scmp.ne.s32.totalorder %s509_s14, %s784_s15  ;;  %p790_p2 = scmp.lt.s32.totalorder %s784_s15, %s784_s15 }
  0x16   :  { %739 = vmatmul.mubr.msk.bf16.gmra.mrb[8].mxu0 %vm133_vm0, %v778_v11  ;;  %755 = vmatmul.mubr.msk.bf16.gmra.mrb[8].mxu1 %vm133_vm0, %v779_v12 }
  0x17   :  { %742 = vmatprep.mubr.msk.bf16.mxu0 %vm133_vm0, %v780_v13  ;;  %758 = vmatprep.mubr.msk.bf16.mxu1 %vm133_vm0, %v781_v14  ;;  %p791_p3 = por %p790_p2, %p789_p1 }
  0x19   :  { %p792_p4 = pnand %p791_p3, %p785_p0 }
  0x1e   :  { %743 = vmatmul.mubr.msk.bf16.gmra.mrb[12].mxu0 %vm133_vm0, %v782_v15  ;;  %759 = vmatmul.mubr.msk.bf16.gmra.mrb[12].mxu1 %vm133_vm0, %v783_v16 }
  0xd9   :  { %v732_v17 = vpop.f32.mrb[0].mxu0  ;;  %v748_v18 = vpop.f32.mrb[0].mxu1 }
  0xda   :  { %v216_v19 = vpop.f32.mrb[1].mxu0  ;;  %v280_v20 = vpop.f32.mrb[1].mxu1 }
  0xdb   :  { %v733_v21 = vpop.f32.mrb[2].mxu0  ;;  %v749_v22 = vpop.f32.mrb[2].mxu1 }
  0xdc   :  { %v624_v23 = vpack.c.bf16 %v733_v21, %v732_v17  ;;  %v664_v24 = vpack.c.bf16 %v749_v22, %v748_v18  ;;  %v219_v25 = vpop.f32.mrb[3].mxu0  ;;  %v283_v26 = vpop.f32.mrb[3].mxu1 }
  0xdd   :  { %v619_v27 = vpack.c.bf16 %v219_v25, %v216_v19  ;;  %v659_v28 = vpack.c.bf16 %v283_v26, %v280_v20 }
  0xde   :  { %696 = vst [vmem:[#allocation2 + $0x8] sm:$0xff] %v624_v23   ;;  %704 = vst [vmem:[#allocation2 + $0x48] sm:$0xff] %v664_v24  }
  0xdf   :  { %620 = vst [vmem:[#allocation2] sm:$0xff] %v619_v27   ;;  %703 = vst [vmem:[#allocation2 + $0x40] sm:$0xff] %v659_v28  }
  0xe1   :  { %v736_v29 = vpop.f32.mrb[4].mxu0  ;;  %v752_v30 = vpop.f32.mrb[4].mxu1 }
  0xe2   :  { %v232_v31 = vpop.f32.mrb[5].mxu0  ;;  %v296_v32 = vpop.f32.mrb[5].mxu1 }
  0xe3   :  { %v737_v33 = vpop.f32.mrb[6].mxu0  ;;  %v753_v34 = vpop.f32.mrb[6].mxu1 }
  0xe4   :  { %v634_v35 = vpack.c.bf16 %v737_v33, %v736_v29  ;;  %v674_v36 = vpack.c.bf16 %v753_v34, %v752_v30  ;;  %v235_v37 = vpop.f32.mrb[7].mxu0  ;;  %v299_v38 = vpop.f32.mrb[7].mxu1 }
  0xe5   :  { %v629_v39 = vpack.c.bf16 %v235_v37, %v232_v31  ;;  %v669_v40 = vpack.c.bf16 %v299_v38, %v296_v32 }
  0xe6   :  { %698 = vst [vmem:[#allocation2 + $0x18] sm:$0xff] %v634_v35   ;;  %706 = vst [vmem:[#allocation2 + $0x58] sm:$0xff] %v674_v36  }
  0xe7   :  { %697 = vst [vmem:[#allocation2 + $0x10] sm:$0xff] %v629_v39   ;;  %705 = vst [vmem:[#allocation2 + $0x50] sm:$0xff] %v669_v40  }
  0xe9   :  { %v740_v41 = vpop.f32.mrb[8].mxu0  ;;  %v756_v42 = vpop.f32.mrb[8].mxu1 }
  0xea   :  { %v248_v43 = vpop.f32.mrb[9].mxu0  ;;  %v312_v44 = vpop.f32.mrb[9].mxu1 }
  0xeb   :  { %v741_v45 = vpop.f32.mrb[10].mxu0  ;;  %v757_v46 = vpop.f32.mrb[10].mxu1 }
  0xec   :  { %v644_v47 = vpack.c.bf16 %v741_v45, %v740_v41  ;;  %v684_v48 = vpack.c.bf16 %v757_v46, %v756_v42  ;;  %v251_v49 = vpop.f32.mrb[11].mxu0  ;;  %v315_v50 = vpop.f32.mrb[11].mxu1 }
  0xed   :  { %v639_v51 = vpack.c.bf16 %v251_v49, %v248_v43  ;;  %v679_v52 = vpack.c.bf16 %v315_v50, %v312_v44 }
  0xee   :  { %700 = vst [vmem:[#allocation2 + $0x28] sm:$0xff] %v644_v47   ;;  %708 = vst [vmem:[#allocation2 + $0x68] sm:$0xff] %v684_v48  }
  0xef   :  { %699 = vst [vmem:[#allocation2 + $0x20] sm:$0xff] %v639_v51   ;;  %707 = vst [vmem:[#allocation2 + $0x60] sm:$0xff] %v679_v52  }
  0xf1   :  { %v744_v53 = vpop.f32.mrb[12].mxu0  ;;  %v760_v54 = vpop.f32.mrb[12].mxu1 }
  0xf2   :  { %v264_v55 = vpop.f32.mrb[13].mxu0  ;;  %v328_v56 = vpop.f32.mrb[13].mxu1 }
  0xf3   :  { %v745_v57 = vpop.f32.mrb[14].mxu0  ;;  %v761_v58 = vpop.f32.mrb[14].mxu1 }
  0xf4   :  { %v654_v59 = vpack.c.bf16 %v745_v57, %v744_v53  ;;  %v694_v60 = vpack.c.bf16 %v761_v58, %v760_v54  ;;  %v267_v61 = vpop.f32.mrb[15].mxu0  ;;  %v331_v62 = vpop.f32.mrb[15].mxu1 }
  0xf5   :  { %v649_v63 = vpack.c.bf16 %v267_v61, %v264_v55  ;;  %v689_v0 = vpack.c.bf16 %v331_v62, %v328_v56 }
  0xf6   :  { %702 = vst [vmem:[#allocation2 + $0x38] sm:$0xff] %v654_v59   ;;  %710 = vst [vmem:[#allocation2 + $0x78] sm:$0xff] %v694_v60  }
  0xf7   :  { %701 = vst [vmem:[#allocation2 + $0x30] sm:$0xff] %v649_v63   ;;  %709 = vst [vmem:[#allocation2 + $0x70] sm:$0xff] %v689_v0  }
  0xf8   :  { %795 = shalt.err (!%p792_p4)
}
  0xf9   :  { %s796_s17 = scalar_lea.hbm %s907_s2, 2048 }
  0xfa   :  { %p797_p5 = scmp.ne.s32.totalorder %s907_s2, %s796_s17  ;;  %p800_p6 = scmp.lt.u32.totalorder %s796_s17, %s907_s2 }
  0xfc   :  { %p802_p7 = pnand %p800_p6, %p797_p5 }
  0xfe   :  { %805 = shalt.err (!%p802_p7)
}
  0xff   :  { %s809_s22 = smov 64   ;;  %s810_s23 = smov 4  }
 0x100   :  { %514 = dma.vmem_to_hbm [thread:$0]  %s509_s14, 2048, %s907_s2, [#allocation3], %s809_s22, %s809_s22, %s810_s23  }
 0x101   :  { %806 = dma.done.wait [#allocation3], 2048  }
 0x102   :  { %807 = vsyncadd [#allocation3], 4294965248 }
 0x103   :  { %518 = vsyncpa [#allocation3], 1 }

</bundles_post_ra>
